<compile_context>
chip_gen: v5e
topology: v5e:2x2
jax: 0.10.0
libtpu: 0.0.40
codegen_flags: <defaults>
</compile_context>

<pallas_src>
import functools

import jax
import jax.numpy as jnp
from jax.experimental import pallas as pl
from jax.experimental.pallas import tpu as pltpu


def down_kernel(x_ref, w_ref, b_ref, o_ref, *, kernel_size):
    """One grid step: a block of batch rows, full pooled length on lanes.

    x_ref : (S, Bb, C_in, Lp)  pool-window-major input block (bf16 or f32)
    w_ref : (K, C_out, C_in)   BN-folded conv weight
    b_ref : (C_out, 1)         BN-folded bias (f32)
    o_ref : (Bb, C_out, Lp)    output block, natural (batch, channel, length)
    """
    s_pool, bb, c_in, lp = x_ref.shape
    c_out = o_ref.shape[1]
    pad = kernel_size // 2

    # --- MaxPool1d: pool window on the leading (untiled) axis -> pure VPU max.
    #     (max is monotonic, so doing it on bf16 inputs is exact.)
    pooled = x_ref[0]
    for s in range(1, s_pool):
        pooled = jnp.maximum(pooled, x_ref[s])
    pooled = pooled.astype(w_ref.dtype)

    # --- 'same' zero padding realized once; each conv tap is then a static
    #     lane slice (no per-tap concat, no iota/modulo mask, no roll).
    if pad > 0:
        zpad = jnp.zeros((bb, c_in, pad), pooled.dtype)
        padded = jnp.concatenate([zpad, pooled, zpad], axis=2)
    else:
        padded = pooled

    # --- Conv1d (BN folded into the weight) as K accumulated MXU matmuls with
    #     f32 accumulation.  Batched einsum has the same dot_general structure
    #     as the standard flash-attention 'bqk,bkd->bqd' pattern.
    acc = None
    for t in range(kernel_size):
        sh = padded[:, :, t:t + lp]                          # (Bb, C_in, Lp)
        w_t = jnp.broadcast_to(w_ref[t], (bb, c_out, c_in))  # tiny broadcast
        part = jnp.einsum('boc,bcl->bol', w_t, sh,
                          preferred_element_type=jnp.float32)
        acc = part if acc is None else acc + part

    # --- folded BatchNorm bias + ReLU, f32 epilogue, store in output dtype.
    y = acc + b_ref[...].astype(jnp.float32)                 # (C_out,1) bcast
    o_ref[...] = jnp.maximum(y, 0.0).astype(o_ref.dtype)


def _vmem_capacity_bytes():
    """Physical VMEM of the current chip (generation aware), with a safe
    v7x-sized fallback if the query API is unavailable."""
    try:
        info = pltpu.get_tpu_info()
        for name in ("vmem_capacity_bytes", "vmem_size_bytes", "vmem_bytes"):
            v = getattr(info, name, None)
            if v:
                return int(v)
    except Exception:
        pass
    return 64 * 1024 * 1024


def _block_bytes(b_blk, s, c_in, c_out, lp, in_bytes):
    """Rough per-grid-step VMEM footprint: double-buffered input/output blocks
    plus in-kernel temporaries (pooled/padded/shifted + f32 accumulator),
    accounting for (sublane, lane) tile padding."""
    sub_in = 8 * (4 // in_bytes)                     # 8 for f32, 16 for bf16
    cin_p = -(-c_in // sub_in) * sub_in
    cout_p = -(-c_out // 8) * 8
    lp_p = -(-lp // 128) * 128
    x_blk = 2 * s * b_blk * cin_p * lp_p * in_bytes          # input, 2 buffers
    o_blk = 2 * b_blk * cout_p * lp_p * 4                    # output, 2 buffers
    tmp = b_blk * lp_p * (3 * cin_p * in_bytes + 2 * cout_p * 4)
    return x_blk + o_blk + tmp


def _choose_batch_block(batch, s, c_in, c_out, lp, in_bytes, budget,
                        target_bytes=8 << 20, max_block=32):
    """Largest divisor of `batch` whose step fits the VMEM budget, stopping
    once the step is comfortably large; keeps >= 2 grid steps when B >= 2 so
    both v7x TensorCores get work.  max_block bounds the per-step batched
    matmul unroll."""
    divs = [b for b in range(1, batch + 1) if batch % b == 0 and b <= max_block]
    cands = [b for b in divs if (b < batch or batch == 1)] or [1]
    best = cands[0]
    for b in sorted(cands):
        if _block_bytes(b, s, c_in, c_out, lp, in_bytes) > budget:
            break
        best = b
        if 2 * s * b * c_in * lp * in_bytes >= target_bytes:
            break
    return best


@functools.partial(jax.jit, static_argnames=(
    "scale_factor", "kernel_size", "eps", "compute_dtype", "batch_block"))
def down_forward(x, w_conv, gamma, beta, running_mean, running_var, *,
                 scale_factor, kernel_size, eps=1e-5,
                 compute_dtype=jnp.bfloat16, batch_block=None):
    """x: (B, C_in, L).  w_conv: (C_out, C_in, K) as in nn.Conv1d (bias=False)."""
    B, C_in, L = x.shape
    C_out, C_in_w, K = w_conv.shape
    assert C_in_w == C_in
    assert K == kernel_size
    assert kernel_size % 2 == 1, "padding=K//2 'same' conv assumes odd K"
    S = scale_factor
    Lp = L // S                                   # MaxPool1d floors like PyTorch

    # --- fold eval-mode BatchNorm into the conv weight and a bias (in f32) ---
    scale = gamma.astype(jnp.float32) * jax.lax.rsqrt(
        running_var.astype(jnp.float32) + eps)
    w_fold = w_conv.astype(jnp.float32) * scale[:, None, None]   # (C_out,C_in,K)
    bias = (beta.astype(jnp.float32)
            - running_mean.astype(jnp.float32) * scale).reshape(C_out, 1)
    # weight layout (K, C_out, C_in): each tap is a clean leading-axis index.
    w_koc = jnp.transpose(w_fold, (2, 0, 1)).astype(compute_dtype)

    # --- streamed input: cast to the compute dtype (bf16 halves HBM bytes;
    #     max-pool is exact on bf16) and take the pool-window-major view.
    #     This is the ONLY layout op; under jit it is a single fusion and
    #     allow_input_fusion lets XLA fuse it into the kernel's input DMA.
    x_t = x[:, :, :Lp * S].astype(compute_dtype)
    x_r = x_t.reshape(B, C_in, Lp, S).transpose(3, 0, 1, 2)      # (S,B,C_in,Lp)

    in_bytes = jnp.dtype(compute_dtype).itemsize
    cap = _vmem_capacity_bytes()
    budget = min(cap // 2, 48 << 20)              # ~half-size budget on v7x
    if batch_block is not None:
        assert B % batch_block == 0
        b_blk = batch_block
    else:
        b_blk = _choose_batch_block(B, S, C_in, C_out, Lp, in_bytes, budget)
    need = _block_bytes(b_blk, S, C_in, C_out, Lp, in_bytes)
    vmem_limit = int(min(cap * 3 // 4, max(need + (4 << 20), 32 << 20)))

    grid = (B // b_blk,)
    kern = functools.partial(down_kernel, kernel_size=K)

    out = pl.pallas_call(
        kern,
        out_shape=jax.ShapeDtypeStruct((B, C_out, Lp), x.dtype),
        grid_spec=pltpu.PrefetchScalarGridSpec(
            num_scalar_prefetch=0,
            grid=grid,
            in_specs=[
                pl.BlockSpec((S, b_blk, C_in, Lp), lambda i: (0, i, 0, 0)),
                pl.BlockSpec((K, C_out, C_in), lambda i: (0, 0, 0)),
                pl.BlockSpec((C_out, 1), lambda i: (0, 0)),
            ],
            out_specs=pl.BlockSpec((b_blk, C_out, Lp), lambda i: (i, 0, 0)),
        ),
        compiler_params=pltpu.CompilerParams(
            dimension_semantics=("parallel",),
            vmem_limit_bytes=vmem_limit,
            # let XLA fuse the cast+reshape+transpose producer of x_r into the
            # kernel's input DMA (no extra HBM round trip for the layout change)
            allow_input_fusion=[True, False, False],
        ),
    )(x_r, w_koc, bias)

    return out                                     # already (B, C_out, Lp)


def down_reference(x, w_conv, gamma, beta, running_mean, running_var,
                   *, scale_factor, kernel_size, eps=1e-5):
    """Pure-JAX reference of the same forward pass (un-folded math)."""
    B, C_in, L = x.shape
    C_out, _, K = w_conv.shape
    Lp = L // scale_factor
    pad = kernel_size // 2
    pooled = x[:, :, :Lp * scale_factor].reshape(B, C_in, Lp, scale_factor).max(axis=-1)
    padded = jnp.pad(pooled, ((0, 0), (0, 0), (pad, pad)))
    acc = jnp.zeros((B, C_out, Lp), jnp.float32)
    for t in range(K):
        acc = acc + jnp.einsum('oc,bcl->bol', w_conv[:, :, t],
                               padded[:, :, t:t + Lp])
    scale = (gamma / jnp.sqrt(running_var + eps))[None, :, None]
    y = (acc - running_mean[None, :, None]) * scale + beta[None, :, None]
    return jnp.maximum(y, 0.0)


if __name__ == "__main__":
    # Module config: Down(in_channels=4, out_channels=8, kernel_size=3, scale_factor=2)
    B, C_in, C_out, L = 2, 4, 8, 16
    kernel_size, scale_factor = 3, 2

    key = jax.random.PRNGKey(0)
    kx, kw, kg, kb, km, kv = jax.random.split(key, 6)

    x = jax.random.normal(kx, (B, C_in, L), dtype=jnp.float32)
    fan_in = C_in * kernel_size
    bound = 1.0 / (fan_in ** 0.5)
    w_conv = jax.random.uniform(kw, (C_out, C_in, kernel_size),
                                minval=-bound, maxval=bound, dtype=jnp.float32)
    gamma = jax.random.uniform(kg, (C_out,), minval=0.5, maxval=1.5, dtype=jnp.float32)
    beta = 0.1 * jax.random.normal(kb, (C_out,), dtype=jnp.float32)
    running_mean = 0.1 * jax.random.normal(km, (C_out,), dtype=jnp.float32)
    running_var = jax.random.uniform(kv, (C_out,), minval=0.5, maxval=1.5,
                                     dtype=jnp.float32)

    ref = down_reference(x, w_conv, gamma, beta, running_mean, running_var,
                         scale_factor=scale_factor, kernel_size=kernel_size)

    # Strict check of the f32 path.
    out_f32 = down_forward(x, w_conv, gamma, beta, running_mean, running_var,
                           scale_factor=scale_factor, kernel_size=kernel_size,
                           compute_dtype=jnp.float32)
    out_f32 = jax.block_until_ready(out_f32)
    assert out_f32.shape == (B, C_out, L // scale_factor), out_f32.shape
    assert jnp.allclose(out_f32, ref, atol=1e-4, rtol=1e-4), \
        float(jnp.max(jnp.abs(out_f32 - ref)))

    # Sanity check of the bf16 streaming path (production default): f32
    # accumulation + f32 epilogue bound the quantization error.
    out_bf16 = down_forward(x, w_conv, gamma, beta, running_mean, running_var,
                            scale_factor=scale_factor, kernel_size=kernel_size,
                            compute_dtype=jnp.bfloat16)
    out_bf16 = jax.block_until_ready(out_bf16)
    assert out_bf16.shape == (B, C_out, L // scale_factor), out_bf16.shape
    assert jnp.allclose(out_bf16, ref, atol=1e-1, rtol=1e-1), \
        float(jnp.max(jnp.abs(out_bf16 - ref)))

    print("KERNEL_OK")
</pallas_src>

<mosaic_0001>
module attributes {stable_mosaic.version = 11 : i64} {
  func.func @down_kernel(%arg0: i32, %arg1: memref<2x1x4x8xf32, #tpu.memory_space<vmem>>, %arg2: memref<3x8x4xf32, #tpu.memory_space<vmem>>, %arg3: memref<8x1xf32, #tpu.memory_space<vmem>>, %arg4: memref<1x8x8xf32, #tpu.memory_space<vmem>>) attributes {dimension_semantics = [#tpu.dimension_semantics<parallel>], iteration_bounds = array<i64: 2>, scalar_prefetch = 0 : i64, scratch_operands = 0 : i64, tpu.core_type = #tpu.core_type<tc>, window_params = [{transform_indices = @transform_0, window_bounds = array<i64: 2, 1, 4, 8>}, {pipeline_mode = #tpu.pipeline_mode<synchronous>, transform_indices = @transform_1, window_bounds = array<i64: 3, 8, 4>}, {pipeline_mode = #tpu.pipeline_mode<synchronous>, transform_indices = @transform_2, window_bounds = array<i64: 8, 1>}, {transform_indices = @transform_3, window_bounds = array<i64: 1, 8, 8>}]} {
    %c0 = arith.constant 0 : index
    %c0_0 = arith.constant 0 : index
    %c0_1 = arith.constant 0 : index
    %c0_2 = arith.constant 0 : index
    %0 = vector.load %arg1[%c0, %c0_0, %c0_1, %c0_2] : memref<2x1x4x8xf32, #tpu.memory_space<vmem>>, vector<1x1x4x8xf32>
    %1 = vector.shape_cast %0 : vector<1x1x4x8xf32> to vector<1x4x8xf32>
    %c1 = arith.constant 1 : index
    %c0_3 = arith.constant 0 : index
    %c0_4 = arith.constant 0 : index
    %c0_5 = arith.constant 0 : index
    %2 = vector.load %arg1[%c1, %c0_3, %c0_4, %c0_5] : memref<2x1x4x8xf32, #tpu.memory_space<vmem>>, vector<1x1x4x8xf32>
    %3 = vector.shape_cast %2 : vector<1x1x4x8xf32> to vector<1x4x8xf32>
    %4 = arith.maximumf %1, %3 : vector<1x4x8xf32>
    %cst = arith.constant 0.000000e+00 : f32
    %5 = vector.broadcast %cst : f32 to vector<1x4x1xf32>
    %6 = tpu.concatenate %5, %4, %5 in 2 : vector<1x4x1xf32>, vector<1x4x8xf32>, vector<1x4x1xf32> -> vector<1x4x10xf32>
    %7 = vector.extract_strided_slice %6 {offsets = [0, 0, 0], sizes = [1, 4, 8], strides = [1, 1, 1]} : vector<1x4x10xf32> to vector<1x4x8xf32>
    %c0_6 = arith.constant 0 : index
    %c0_7 = arith.constant 0 : index
    %c0_8 = arith.constant 0 : index
    %8 = vector.load %arg2[%c0_6, %c0_7, %c0_8] : memref<3x8x4xf32, #tpu.memory_space<vmem>>, vector<1x8x4xf32>
    %9 = vector.shape_cast %8 : vector<1x8x4xf32> to vector<8x4xf32>
    %10 = vector.shape_cast %9 : vector<8x4xf32> to vector<1x8x4xf32>
    "tpu.trace_start"() <{level = 10 : i32, message = "boc,bcl->bol"}> : () -> ()
    %cst_9 = arith.constant dense<0.000000e+00> : vector<1x8x8xf32>
    %11 = tpu.matmul %10, %7, %cst_9 {dimension_numbers = #tpu.dot_dimension_numbers<[2], [1], [1], [2], [0, 0, 0, 1, 1, 2], [0], [0]>} : vector<1x8x4xf32>, vector<1x4x8xf32>, vector<1x8x8xf32> -> vector<1x8x8xf32>
    "tpu.trace_stop"() : () -> ()
    %12 = vector.extract_strided_slice %6 {offsets = [0, 0, 1], sizes = [1, 4, 8], strides = [1, 1, 1]} : vector<1x4x10xf32> to vector<1x4x8xf32>
    %c1_10 = arith.constant 1 : index
    %c0_11 = arith.constant 0 : index
    %c0_12 = arith.constant 0 : index
    %13 = vector.load %arg2[%c1_10, %c0_11, %c0_12] : memref<3x8x4xf32, #tpu.memory_space<vmem>>, vector<1x8x4xf32>
    %14 = vector.shape_cast %13 : vector<1x8x4xf32> to vector<8x4xf32>
    %15 = vector.shape_cast %14 : vector<8x4xf32> to vector<1x8x4xf32>
    "tpu.trace_start"() <{level = 10 : i32, message = "boc,bcl->bol"}> : () -> ()
    %cst_13 = arith.constant dense<0.000000e+00> : vector<1x8x8xf32>
    %16 = tpu.matmul %15, %12, %cst_13 {dimension_numbers = #tpu.dot_dimension_numbers<[2], [1], [1], [2], [0, 0, 0, 1, 1, 2], [0], [0]>} : vector<1x8x4xf32>, vector<1x4x8xf32>, vector<1x8x8xf32> -> vector<1x8x8xf32>
    "tpu.trace_stop"() : () -> ()
    %17 = arith.addf %11, %16 : vector<1x8x8xf32>
    %18 = vector.extract_strided_slice %6 {offsets = [0, 0, 2], sizes = [1, 4, 8], strides = [1, 1, 1]} : vector<1x4x10xf32> to vector<1x4x8xf32>
    %c2 = arith.constant 2 : index
    %c0_14 = arith.constant 0 : index
    %c0_15 = arith.constant 0 : index
    %19 = vector.load %arg2[%c2, %c0_14, %c0_15] : memref<3x8x4xf32, #tpu.memory_space<vmem>>, vector<1x8x4xf32>
    %20 = vector.shape_cast %19 : vector<1x8x4xf32> to vector<8x4xf32>
    %21 = vector.shape_cast %20 : vector<8x4xf32> to vector<1x8x4xf32>
    "tpu.trace_start"() <{level = 10 : i32, message = "boc,bcl->bol"}> : () -> ()
    %cst_16 = arith.constant dense<0.000000e+00> : vector<1x8x8xf32>
    %22 = tpu.matmul %21, %18, %cst_16 {dimension_numbers = #tpu.dot_dimension_numbers<[2], [1], [1], [2], [0, 0, 0, 1, 1, 2], [0], [0]>} : vector<1x8x4xf32>, vector<1x4x8xf32>, vector<1x8x8xf32> -> vector<1x8x8xf32>
    "tpu.trace_stop"() : () -> ()
    %23 = arith.addf %17, %22 : vector<1x8x8xf32>
    %c0_17 = arith.constant 0 : index
    %c0_18 = arith.constant 0 : index
    %24 = vector.load %arg3[%c0_17, %c0_18] : memref<8x1xf32, #tpu.memory_space<vmem>>, vector<8x1xf32>
    %25 = vector.shape_cast %24 : vector<8x1xf32> to vector<1x8x1xf32>
    %26 = vector.broadcast %25 : vector<1x8x1xf32> to vector<1x8x8xf32>
    %27 = arith.addf %23, %26 : vector<1x8x8xf32>
    %cst_19 = arith.constant 0.000000e+00 : f32
    %28 = vector.broadcast %cst_19 : f32 to vector<1x8x8xf32>
    %29 = arith.maximumf %27, %28 : vector<1x8x8xf32>
    %c0_20 = arith.constant 0 : index
    %c0_21 = arith.constant 0 : index
    %c0_22 = arith.constant 0 : index
    %30 = vector.load %arg4[%c0_20, %c0_21, %c0_22] : memref<1x8x8xf32, #tpu.memory_space<vmem>>, vector<1x8x8xf32>
    tpu.vector_store %arg4[%c0_20, %c0_21, %c0_22], %29 {strides = array<i32>} : memref<1x8x8xf32, #tpu.memory_space<vmem>>, vector<1x8x8xf32>,
    return
  }
  func.func @transform_0(%arg0: i32) -> (i32, i32, i32, i32) {
    %c0_i32 = arith.constant 0 : i32
    %c0_i32_0 = arith.constant 0 : i32
    %c0_i32_1 = arith.constant 0 : i32
    %c0_i32_2 = arith.constant 0 : i32
    return %c0_i32, %arg0, %c0_i32_0, %c0_i32_1 : i32, i32, i32, i32
  }
  func.func @transform_1(%arg0: i32) -> (i32, i32, i32) {
    %c0_i32 = arith.constant 0 : i32
    %c0_i32_0 = arith.constant 0 : i32
    %c0_i32_1 = arith.constant 0 : i32
    %c0_i32_2 = arith.constant 0 : i32
    return %c0_i32, %c0_i32_0, %c0_i32_1 : i32, i32, i32
  }
  func.func @transform_2(%arg0: i32) -> (i32, i32) {
    %c0_i32 = arith.constant 0 : i32
    %c0_i32_0 = arith.constant 0 : i32
    %c0_i32_1 = arith.constant 0 : i32
    return %c0_i32, %c0_i32_0 : i32, i32
  }
  func.func @transform_3(%arg0: i32) -> (i32, i32, i32) {
    %c0_i32 = arith.constant 0 : i32
    %c0_i32_0 = arith.constant 0 : i32
    %c0_i32_1 = arith.constant 0 : i32
    return %arg0, %c0_i32, %c0_i32_0 : i32, i32, i32
  }
}

</mosaic_0001>

<bundles_post_ra>
// kernel: down_forward.2
= control target key start
LH: loop header
LB: loop body
LE: loop exit
PB: predicated region body
PF: predicated region fallthrough
CT: control target
= control target key end

     0   :  { %8 = vsyncpa [#allocation3], 0  ;;  %s613_s0 = inlined_call_operand.vmem [shape: f32[3,8,4], index: 0, kind: input, shape index: {}]   ;;  %s614_s1 = inlined_call_operand.vmem [shape: f32[8,1], index: 1, kind: input, shape index: {}]   ;;  %s615_s2 = inlined_call_operand.vmem [shape: f32[2,4,8,2], index: 2, kind: input, shape index: {}]   ;;  %s616_s3 = inlined_call_operand.hbm [shape: f32[2,8,8], index: 3, kind: output, shape index: {}]  }
   0x1   :  { %10 = vsyncpa [#allocation3 + $0x1], 0  ;;  %s513_s12 = smov 0   ;;  %s515_s13 = smov 0  }
   0x2   :  { %s517_s14 = smov 0   ;;  %s519_s15 = smov 0  }
   0x3 LB: > { %s534_s16 = sadd.s32 4294967295, %s487_s15   ;;  %s361_s17 = sadd.s32 4294967294, %s487_s15   ;;  %s487_s15 = sphi %s519_s15, %s622_s15   ;;  %s483_s14 = sphi %s517_s14, %s621_s14   ;;  %s479_s13 = sphi %s515_s13, %s620_s13   ;;  %s475_s12 = sphi %s513_s12, %s619_s12  }
   0x4   : > { %s538_s18 = sadd.s32 1, %s487_s15   ;;  %s91_s19 = sadd.s32 1, %s483_s14 }
   0x5   : > { %s88_s20 = ssub.s32 %s487_s15, %s538_s18  ;;  %p101_p0 = scmp.ne.s32.totalorder %s483_s14, %s479_s13 }
   0x6   : > { %p89_p1 = scmp.eq.s32.totalorder %s88_s20, 0  ;;  %p102_p2 = scmp.eq.s32.totalorder %s534_s16, 1 }
   0x7   : > { %p107_p3 = scmp.ne.s32.totalorder %s479_s13, %s475_s12  ;;  %p108_p4 = scmp.eq.s32.totalorder %s361_s17, 1 }
   0x8   : > { %s549_s21 = scalar_select %p89_p1, %s483_s14, %s91_s19  }
   0x9   : > { %p551_p5 = por %p102_p2, %p101_p0  ;;  %p555_p6 = por %p108_p4, %p107_p3 }
   0xa   : > { %p364_p7 = scmp.ge.s32.totalorder %s487_s15, 1  ;;  %p139_p8 = scmp.lt.s32.totalorder %s487_s15, 3 }
   0xc   : > { %p140_p9 = pnand %p364_p7, %p139_p8 }
   0xe   : > { %143 = sbr.rel (%p140_p9) target bundleno = 411 (0x19b), region = 32 }
  0x13   : > { %p162_p10 = scmp.lt.s32.totalorder %s534_s16, 1  ;;  %s489_s29 = smov 1   ;;  %vm184_vm0 = vcmask 7168   ;;  %vm186_vm1 = vcmask 72704   ;;  %vm198_vm2 = vcmask 1043456   ;;  %vm194_vm3 = vcmask 31744  }
  0x14   : > { %s490_s30 = smov 127   ;;  %s491_s4 = smov 126   ;;  %v188_v8 = vld [vmem:[%s613_s0] sm:$0xff]  ;;  %v492_v10 = vmov 0   ;;  %v373_v11 = vld [vmem:[%s613_s0 + $0x10] sm:$0xff]  ;;  %v368_v12 = vld [vmem:[%s613_s0 + $0x8] sm:$0xff] }
  0x15   : > { %s163_s24 = scalar_select %p162_p10, %s534_s16, 1  ;;  %v276_v9 = vld [vmem:[%s614_s1] sm:$0xff]  ;;  %423 = vset.pattern.permute.xlu1 %v492_v10  ;;  %424 = vset.pattern.permute.xlu0 %v492_v10  ;;  %vm284_vm4 = vcmask 64512  }
  0x16   : > { %s159_s19 = sand.u32 1, %s479_s13   ;;  %s445_s8 = scalar_lea.hbm %s616_s3, 16 }
  0x17   : > { %s366_s25 = sshll.u32 %s163_s24, 2  ;;  %s365_s20 = sshll.u32 %s159_s19, 3 }
  0x18   : > { %s165_s28 = scalar_lea.vmem %s615_s2, %s366_s25  ;;  %s377_s24 = sshll.u32 %s534_s16, 3 }
  0x19   : > { %v166_v0 = vld [vmem:[%s165_s28] sm:$0xf]  ;;  %v367_v1 = vld [vmem:[%s165_s28 + $0x8] sm:$0xf]  ;;  %s297_s27 = scalar_lea.hbm %s616_s3, %s377_s24  ;;  %s161_s28 = scalar_lea.vmem [#allocation2], %s365_s20 }
  0x1a   : > { %169 = vst [vmem:[#allocation4] sm:$0xf] %v166_v0 }
  0x1b   : > { %175 = vst [vmem:[#allocation4 + $0x4] sm:$0xf] %v367_v1 }
  0x21   : > { %v176_v2 = vld [vmem:[#allocation4] sm:$0xf] }
  0x22   : > { %v178_v3 = vld [vmem:[#allocation4 + $0x4] sm:$0xf] }
  0x23   : > { %v179_v4 = vmax.f32 %v176_v2, %v178_v3 }
  0x25   : > { %181 = vrot.lane.b32.xlu0 %v179_v4, %s489_s29  ;;  %s299_s29 = sshll.u32 %s161_s28, 4  ;;  %s300_s29 = int_to_ptr.vmem [resolvable:$true] %s299_s29 }
  0x97   : > { %v182_v5 = vpop.permute.xlu0 %181 }
  0x98   : > { %v185_v6 = vsel %vm184_vm0, 0.0, %v182_v5 }
  0x99   : > { %v187_v7 = vsel %vm186_vm1, %v185_v6, 0.0 }
  0x9a   : > { %192 = vrot.lane.b32.xlu1 %v187_v7, %s490_s30  ;;  %248 = vrot.lane.b32.xlu0 %v187_v7, %s491_s4  ;;  %s301_s30 = sshll.u32 %s297_s27, 4  ;;  %s287_s4 = scalar_lea.sflag [#allocation3], %s159_s19  ;;  %s302_s30 = int_to_ptr.hbm [resolvable:$true] %s301_s30 }
  0x9b   : > { %371 = vmatpush.msk.msra.mxu1 %vm198_vm2, %v187_v7  ;;  %s439_s16 = sshra.s32 %s302_s30, 4  ;;  %s440_s16 = int_to_ptr.hbm [resolvable:$true] %s439_s16 }
  0x9c   : > { %372 = vmatmul.msk.f32.vlgmr.msra.gmra.mxu1 %vm194_vm3, %v188_v8  ;;  %s441_s5 = scalar_lea.hbm %s440_s16, 8  ;;  %p446_p0 = scmp.lt.s32.totalorder %s440_s16, %s616_s3 }
  0x9d   : > { %p442_p11 = scmp.ne.s32.totalorder %s440_s16, %s441_s5  ;;  %p447_p1 = scmp.lt.s32.totalorder %s445_s8, %s441_s5 }
  0x9f   : > { %p443_p12 = pnand %p442_p11, %p551_p5  ;;  %p448_p2 = por %p447_p1, %p446_p0 }
  0xa1   : > { %p444_p13 = pneg %p443_p12 }
  0xa2   : > { %279 = vperm.xlu1 %423, %v276_v9  }
  0xa3   : > { %p449_p3 = pnand %p448_p2, %p444_p13 }
 0x10c   : > { %v193_v13 = vpop.permute.xlu1 %192  ;;  %v249_v14 = vpop.permute.xlu0 %248 }
 0x10d   : > { %369 = vmatpush.msk.msra.mxu0 %vm198_vm2, %v193_v13  ;;  %374 = vmatpush.msk.msra.mxu2 %vm198_vm2, %v249_v14 }
 0x10e   : > { %375 = vmatmul.msk.f32.vlgmr.msra.gmra.mxu2 %vm194_vm3, %v373_v11  ;;  %370 = vmatmul.msk.f32.vlgmr.msra.gmra.mxu0 %vm194_vm3, %v368_v12 }
 0x114   : > { %v280_v19 = vpop.permute.xlu1 %279 }
 0x119   : > { %v243_v16 = vpop.f32.mrf.mxu1 }
 0x18b   : > { %v218_v15 = vpop.f32.mrf.mxu0 }
 0x18c   : > { %v244_v17 = vadd.f32 %v243_v16, %v218_v15 }
 0x191   : > { %v272_v18 = vpop.f32.mrf.mxu2 }
 0x192   : > { %v275_v20 = vadd.f32 %v272_v18, %v244_v17 }
 0x194   : > { %v282_v21 = vadd.f32 %v280_v19, %v275_v20 }
 0x196   : > { %v283_v22 = vmax.f32 %v282_v21, 0.0 }
 0x198   : > { %285 = vst.msk [vmem:[%s161_s28] sm:$0xff] %vm284_vm4, %v283_v22 }
 0x199   : > { %452 = shalt.err (!%p449_p3)
}
 0x19a   : > { %380 = dma.vmem_to_hbm [thread:$0]  (%p551_p5), %s300_s29, 128, %s302_s30, %s287_s4  }
 0x19b PF: > { %p386_p4 = scmp.ge.s32.totalorder %s487_s15, 2  ;;  %s313_s11 = sand.u32 1, %s475_s12  }
 0x19c   : > { %s314_s17 = scalar_lea.sflag [#allocation3], %s313_s11 }
 0x19d   : > { %p383_p7 = pnand %p386_p4, %p555_p6 }
 0x19f   : > { %p384_p8 = pneg %p383_p7 }
 0x1a1   : > { %470 = dma.done.wait (%p384_p8), %s314_s17, 128  }
 0x1a2   : > { %472 = vsyncadd (%p384_p8), %s314_s17, 4294967168  ;;  %p13_p9 = scmp.ge.s32.totalorder %s538_s18, 4   ;;  %s619_s12 = smov %s479_s13 }
 0x1a3   : > { %s620_s13 = smov %s483_s14  ;;  %s621_s14 = smov %s549_s21 }
 0x1a4   : > { %s622_s15 = smov %s538_s18  ;;  %15 = sbr.rel (!%p13_p9) target bundleno = 3 (0x3), region = 72 }
 0x1a9   :  { %320 = vsyncpa [#allocation3], 1 }
 0x1aa   :  { %322 = vsyncpa [#allocation3 + $0x1], 1 }

</bundles_post_ra>
